<compile_context>
chip_gen: v5e
topology: v5e:2x2
jax: 0.10.0
libtpu: 0.0.40
codegen_flags: <defaults>
</compile_context>

<pallas_src>
import jax
import jax.numpy as jnp
from jax.experimental import pallas as pl
from jax.experimental.pallas import tpu as pltpu

# Conv hyper-params implied by the module
CIN, COUT, KH, KW = 3, 64, 3, 3
K = KH * KW * CIN          # 27  : im2col contraction depth
K_PAD = 32                 # zero-padded contraction depth (sublane friendly)
COUT_PAD = 128             # lane-dense output width (full 128-lane stores)
TILE_M = 512               # im2col rows per grid step (multiple of 8)


def _round_up(x, m):
    return (x + m - 1) // m * m


def _conv_gemm_kernel(p_ref, w_ref, b_ref, o_ref):
    """Fused im2col-GEMM + bias for one (batch, row-tile) grid step.

    p_ref: (1, tile_m, K_PAD)     im2col patches   VMEM
    w_ref: (K_PAD, COUT_PAD)      flat conv weight VMEM
    b_ref: (1, COUT_PAD)          bias             VMEM
    o_ref: (1, tile_m, COUT_PAD)  output slab      VMEM
    """
    acc = jnp.dot(p_ref[0], w_ref[...], preferred_element_type=jnp.float32)
    o_ref[0] = (acc + b_ref[...]).astype(o_ref.dtype)


def conv2d_tudui(x_nchw, w_oihw, bias):
    """Forward pass of Tudui: conv2d(x, w, b), stride 1, no padding.

    x_nchw: (N, CIN, H, W) float32
    w_oihw: (COUT, CIN, KH, KW) float32
    bias:   (COUT,) float32
    returns (N, COUT, OH, OW) float32 (PyTorch NCHW convention)
    """
    N, C, H, W = x_nchw.shape
    assert C == CIN
    OH, OW = H - KH + 1, W - KW + 1
    M = OH * OW

    # ---- layout plumbing in plain JAX (glue, not compute) ----
    x_nhwc = jnp.transpose(x_nchw, (0, 2, 3, 1))                 # NCHW -> NHWC

    # im2col: K ordering is (kh, kw, cin); patches[n, oh*OW+ow, k] =
    #   x[n, oh+kh, ow+kw, cin]
    taps = [x_nhwc[:, kh:kh + OH, kw:kw + OW, :]
            for kh in range(KH) for kw in range(KW)]
    patches = jnp.concatenate(taps, axis=-1).reshape(N, M, K)

    # Row tiling (pad M so every block is a multiple of 8 sublanes).
    tile_m = min(TILE_M, _round_up(M, 8))
    m_pad = _round_up(M, tile_m)
    patches = jnp.pad(patches, ((0, 0), (0, m_pad - M), (0, K_PAD - K)))

    # Weight OIHW -> flat (K, COUT) with matching (kh, kw, cin) ordering,
    # zero-padded to a single clean (K_PAD, COUT_PAD) VMEM tile.
    w_flat = jnp.transpose(w_oihw, (2, 3, 1, 0)).reshape(K, COUT)
    w_flat = jnp.pad(w_flat, ((0, K_PAD - K), (0, COUT_PAD - COUT)))
    b_pad = jnp.pad(bias, (0, COUT_PAD - COUT)).reshape(1, COUT_PAD)

    grid = (N, m_pad // tile_m)

    out = pl.pallas_call(
        _conv_gemm_kernel,
        out_shape=jax.ShapeDtypeStruct((N, m_pad, COUT_PAD), jnp.float32),
        grid_spec=pltpu.PrefetchScalarGridSpec(
            num_scalar_prefetch=0,
            grid=grid,
            in_specs=[
                pl.BlockSpec((1, tile_m, K_PAD), lambda n, m: (n, m, 0)),
                pl.BlockSpec((K_PAD, COUT_PAD), lambda n, m: (0, 0)),
                pl.BlockSpec((1, COUT_PAD), lambda n, m: (0, 0)),
            ],
            out_specs=pl.BlockSpec((1, tile_m, COUT_PAD),
                                   lambda n, m: (n, m, 0)),
        ),
        compiler_params=pltpu.CompilerParams(
            dimension_semantics=("parallel", "parallel")),
    )(patches, w_flat, b_pad)

    # Drop padding, back to PyTorch NCHW.
    out = out[:, :M, :COUT].reshape(N, OH, OW, COUT)
    return jnp.transpose(out, (0, 3, 1, 2))


def _reference_conv(x_nchw, w_oihw, bias):
    """Pure-JAX reference (matches PyTorch nn.Conv2d semantics)."""
    y = jax.lax.conv_general_dilated(
        x_nchw, w_oihw, window_strides=(1, 1), padding="VALID",
        dimension_numbers=("NCHW", "OIHW", "NCHW"))
    return y + bias.reshape(1, COUT, 1, 1)


if __name__ == "__main__":
    key = jax.random.PRNGKey(0)
    kx, kw, kb = jax.random.split(key, 3)

    # Small shapes consistent with the module: batch=2, C=3, spatial=16
    N, H, W = 2, 16, 16
    x = jax.random.normal(kx, (N, CIN, H, W), dtype=jnp.float32)

    # Deterministic synthetic parameters (shapes match nn.Conv2d(3, 64, 3))
    fan_in = CIN * KH * KW
    bound = 1.0 / (fan_in ** 0.5)
    w = jax.random.uniform(kw, (COUT, CIN, KH, KW), jnp.float32, -bound, bound)
    b = jax.random.uniform(kb, (COUT,), jnp.float32, -bound, bound)

    y = conv2d_tudui(x, w, b)
    y = jax.block_until_ready(y)

    y_ref = _reference_conv(x, w, b)
    assert y.shape == (N, COUT, H - 2, W - 2), y.shape
    assert jnp.allclose(y, y_ref, atol=1e-4, rtol=1e-4), "mismatch vs reference"

    print("KERNEL_OK")
</pallas_src>

<mosaic_0001>
module attributes {stable_mosaic.version = 11 : i64} {
  func.func @_conv_gemm_kernel(%arg0: i32, %arg1: i32, %arg2: memref<1x200x32xf32, #tpu.memory_space<vmem>>, %arg3: memref<32x128xf32, #tpu.memory_space<vmem>>, %arg4: memref<1x128xf32, #tpu.memory_space<vmem>>, %arg5: memref<1x200x128xf32, #tpu.memory_space<vmem>>) attributes {dimension_semantics = [#tpu.dimension_semantics<parallel>, #tpu.dimension_semantics<parallel>], iteration_bounds = array<i64: 2, 1>, scalar_prefetch = 0 : i64, scratch_operands = 0 : i64, tpu.core_type = #tpu.core_type<tc>, window_params = [{transform_indices = @transform_0, window_bounds = array<i64: 1, 200, 32>}, {pipeline_mode = #tpu.pipeline_mode<synchronous>, transform_indices = @transform_1, window_bounds = array<i64: 32, 128>}, {pipeline_mode = #tpu.pipeline_mode<synchronous>, transform_indices = @transform_2, window_bounds = array<i64: 1, 128>}, {transform_indices = @transform_3, window_bounds = array<i64: 1, 200, 128>}]} {
    %c0 = arith.constant 0 : index
    %c0_0 = arith.constant 0 : index
    %c0_1 = arith.constant 0 : index
    %0 = vector.load %arg2[%c0, %c0_0, %c0_1] : memref<1x200x32xf32, #tpu.memory_space<vmem>>, vector<1x200x32xf32>
    %1 = vector.shape_cast %0 : vector<1x200x32xf32> to vector<200x32xf32>
    %c0_2 = arith.constant 0 : index
    %c0_3 = arith.constant 0 : index
    %2 = vector.load %arg3[%c0_2, %c0_3] : memref<32x128xf32, #tpu.memory_space<vmem>>, vector<32x128xf32>
    %cst = arith.constant dense<0.000000e+00> : vector<200x128xf32>
    %3 = tpu.matmul %1, %2, %cst {dimension_numbers = #tpu.dot_dimension_numbers<[1], [0], [0], [1], [0, 0, 1, 1], [], []>} : vector<200x32xf32>, vector<32x128xf32>, vector<200x128xf32> -> vector<200x128xf32>
    %c0_4 = arith.constant 0 : index
    %c0_5 = arith.constant 0 : index
    %4 = vector.load %arg4[%c0_4, %c0_5] : memref<1x128xf32, #tpu.memory_space<vmem>>, vector<1x128xf32>
    %5 = vector.broadcast %4 : vector<1x128xf32> to vector<200x128xf32>
    %6 = arith.addf %3, %5 : vector<200x128xf32>
    %c0_6 = arith.constant 0 : index
    %c0_7 = arith.constant 0 : index
    %c0_8 = arith.constant 0 : index
    %7 = vector.load %arg5[%c0_6, %c0_7, %c0_8] : memref<1x200x128xf32, #tpu.memory_space<vmem>>, vector<1x200x128xf32>
    %8 = vector.shape_cast %7 : vector<1x200x128xf32> to vector<200x128xf32>
    %9 = vector.shape_cast %6 : vector<200x128xf32> to vector<1x200x128xf32>
    tpu.vector_store %arg5[%c0_6, %c0_7, %c0_8], %9 {strides = array<i32>} : memref<1x200x128xf32, #tpu.memory_space<vmem>>, vector<1x200x128xf32>,
    return
  }
  func.func @transform_0(%arg0: i32, %arg1: i32) -> (i32, i32, i32) {
    %c0_i32 = arith.constant 0 : i32
    %c0_i32_0 = arith.constant 0 : i32
    return %arg0, %arg1, %c0_i32 : i32, i32, i32
  }
  func.func @transform_1(%arg0: i32, %arg1: i32) -> (i32, i32) {
    %c0_i32 = arith.constant 0 : i32
    %c0_i32_0 = arith.constant 0 : i32
    %c0_i32_1 = arith.constant 0 : i32
    return %c0_i32, %c0_i32_0 : i32, i32
  }
  func.func @transform_2(%arg0: i32, %arg1: i32) -> (i32, i32) {
    %c0_i32 = arith.constant 0 : i32
    %c0_i32_0 = arith.constant 0 : i32
    %c0_i32_1 = arith.constant 0 : i32
    return %c0_i32, %c0_i32_0 : i32, i32
  }
  func.func @transform_3(%arg0: i32, %arg1: i32) -> (i32, i32, i32) {
    %c0_i32 = arith.constant 0 : i32
    %c0_i32_0 = arith.constant 0 : i32
    return %arg0, %arg1, %c0_i32 : i32, i32, i32
  }
}

</mosaic_0001>

<bundles_post_ra>
// kernel: tpu_custom_call.1
= control target key start
LH: loop header
LB: loop body
LE: loop exit
PB: predicated region body
PF: predicated region fallthrough
CT: control target
= control target key end

     0   :  { %8 = vsyncpa [#allocation3], 0  ;;  %s955_s0 = inlined_call_operand.vmem [shape: f32[2,200,32], index: 0, kind: input, shape index: {}]   ;;  %s956_s1 = inlined_call_operand.vmem [shape: f32[32,128], index: 1, kind: input, shape index: {}]   ;;  %s957_s2 = inlined_call_operand.vmem [shape: f32[1,128], index: 2, kind: input, shape index: {}]   ;;  %s958_s3 = inlined_call_operand.hbm [shape: f32[2,200,128], index: 3, kind: output, shape index: {}]  }
   0x1   :  { %10 = vsyncpa [#allocation3 + $0x1], 0  ;;  %s732_s12 = smov 0   ;;  %s734_s13 = smov 0  }
   0x2   :  { %s736_s14 = smov 0   ;;  %s738_s15 = smov 0  }
   0x3   :  { %s740_s16 = smov 0   ;;  %s742_s17 = smov 0  }
   0x4 LB: > { %s523_s18 = sadd.s32 4294967295, %s708_s17   ;;  %s524_s19 = sadd.s32 4294967294, %s708_s17   ;;  %s708_s17 = sphi %s742_s17, %s16_s17   ;;  %s704_s16 = sphi %s740_s16, %s965_s16   ;;  %s700_s15 = sphi %s738_s15, %s964_s15   ;;  %s696_s14 = sphi %s736_s14, %s963_s14   ;;  %s692_s13 = sphi %s734_s13, %s962_s13   ;;  %s688_s12 = sphi %s732_s12, %s961_s12  }
   0x5   : > { %s28_s20 = sadd.s32 1, %s704_s16  ;;  %s107_s21 = sadd.s32 1, %s696_s14 }
   0x6   : > { %p30_p0 = scmp.ge.s32.totalorder %s28_s20, 2  ;;  %p117_p1 = scmp.ne.s32.totalorder %s696_s14, %s692_s13 }
   0x7   : > { %p118_p2 = scmp.eq.s32.totalorder %s523_s18, 1  ;;  %p123_p3 = scmp.ne.s32.totalorder %s692_s13, %s688_s12 }
   0x8   : > { %s967_s20 = smov (%p30_p0, %s28_s20), 0  ;;  %p124_p5 = scmp.eq.s32.totalorder %s524_s19, 1 }
   0x9   : > { %p772_p4 = por %p118_p2, %p117_p1  ;;  %s102_s23 = ssub.s32 %s704_s16, %s967_s20 }
   0xa   : > { %p527_p6 = scmp.ge.s32.totalorder %s708_s17, 1  ;;  %p105_p7 = scmp.eq.s32.totalorder %s102_s23, 0 }
   0xb   : > { %p779_p8 = por %p124_p5, %p123_p3  ;;  %p161_p9 = scmp.lt.s32.totalorder %s708_s17, 3 }
   0xc   : > { %s785_s25 = scalar_select %p105_p7, %s696_s14, %s107_s21  }
   0xd   : > { %p162_p10 = pnand %p527_p6, %p161_p9 }
   0xe   : > { %p190_p11 = scmp.lt.s32.totalorder (!%p162_p10), %s700_s15, 1  ;;  %s186_s18 = sand.u32 (!%p162_p10), 1, %s692_s13  }
   0xf   : > { %165 = sbr.rel (%p162_p10) target bundleno = 214 (0xd6), region = 32  ;;  %s650_s10 = scalar_lea.hbm (!%p162_p10), %s958_s3, 400 }
  0x10   : > { %s569_s19 = smul.u32 (!%p162_p10), 200, %s186_s18 }
  0x11   : > { %s571_s27 = smul.u32 (!%p162_p10), 200, %s700_s15 }
  0x12   : > { %s866_s26 = scalar_lea.vmem (!%p162_p10), [#allocation2], %s569_s19 }
  0x13   : > { %s440_s30 = scalar_lea.hbm (!%p162_p10), %s958_s3, %s571_s27  ;;  %s441_s4 = sshll.u32 (!%p162_p10), %s866_s26, 4  ;;  %s442_s4 = int_to_ptr.vmem [resolvable:$true] %s441_s4 }
  0x14   : > { %v228_v0 = vld [vmem:[%s956_s1 + $0x18] sm:$0xff]  ;;  %v227_v1 = vld [vmem:[%s956_s1 + $0x10] sm:$0xff]  ;;  %v226_v2 = vld [vmem:[%s956_s1 + $0x8] sm:$0xff]  ;;  %s191_s5 = scalar_select %p190_p11, %s700_s15, 1  ;;  %vm233_vm0 = vcmask 261120  }
  0x15   : > { %558 = vmatpush.msra.mxu2 %v228_v0  ;;  %559 = vmatpush.msra.mxu3 %v228_v0  ;;  %v225_v3 = vld [vmem:[%s956_s1] sm:$0xff]  ;;  %s427_s15 = scalar_lea.sflag [#allocation3], %s186_s18 }
  0x16   : > { %321 = vmatpush.msra.mxu0 %v228_v0  ;;  %557 = vmatpush.msra.mxu1 %v228_v0  ;;  %s570_s8 = smul.u32 200, %s191_s5  ;;  %v862_v29 = vld [vmem:[%s957_s2] ss:$0 sm:$0xff]  ;;  %s443_s5 = sshll.u32 %s440_s30, 4  ;;  %s444_s5 = int_to_ptr.hbm [resolvable:$true] %s443_s5 }
  0x17   : > { %561 = vmatpush.msra.mxu2 %v227_v1  ;;  %562 = vmatpush.msra.mxu3 %v227_v1  ;;  %s644_s6 = sshra.s32 %s444_s5, 4  ;;  %s645_s6 = int_to_ptr.hbm [resolvable:$true] %s644_s6 }
  0x18   : > { %322 = vmatpush.msra.mxu0 %v227_v1  ;;  %560 = vmatpush.msra.mxu1 %v227_v1  ;;  %s804_s11 = scalar_lea.vmem %s955_s0, %s570_s8  ;;  %s646_s7 = scalar_lea.hbm %s645_s6, 200 }
  0x19   : > { %564 = vmatpush.msra.mxu2 %v226_v2  ;;  %565 = vmatpush.msra.mxu3 %v226_v2  ;;  %v212_v4 = vld [vmem:[%s804_s11 + $0x60] sm:$0xff]  ;;  %v219_v5 = vld [vmem:[%s804_s11 + $0x98] sm:$0xff]  ;;  %v206_v7 = vld [vmem:[%s804_s11 + $0x30] sm:$0xff]  ;;  %p647_p12 = scmp.ne.s32.totalorder %s645_s6, %s646_s7  ;;  %p651_p1 = scmp.lt.s32.totalorder %s645_s6, %s958_s3 }
  0x1a   : > { %323 = vmatpush.msra.mxu0 %v226_v2  ;;  %563 = vmatpush.msra.mxu1 %v226_v2  ;;  %v200_v6 = vld [vmem:[%s804_s11] sm:$0xff]  ;;  %v213_v8 = vld [vmem:[%s804_s11 + $0x68] sm:$0xff]  ;;  %v207_v11 = vld [vmem:[%s804_s11 + $0x38] sm:$0xff]  ;;  %p652_p2 = scmp.lt.s32.totalorder %s650_s10, %s646_s7 }
  0x1b   : > { %567 = vmatpush.msra.mxu2 %v225_v3  ;;  %568 = vmatpush.msra.mxu3 %v225_v3  ;;  %v220_v9 = vld [vmem:[%s804_s11 + $0xa0] sm:$0xff]  ;;  %v201_v10 = vld [vmem:[%s804_s11 + $0x8] sm:$0xff]  ;;  %v214_v12 = vld [vmem:[%s804_s11 + $0x70] sm:$0xff]  ;;  %p648_p13 = pnand %p647_p12, %p772_p4 }
  0x1c   : > { %541 = vmatmul.msk.f32.vlgmr.msra.gmra.mxu2 %vm233_vm0, %v212_v4  ;;  %548 = vmatmul.msk.f32.vlgmr.msra.gmra.mxu3 %vm233_vm0, %v219_v5  ;;  %v221_v13 = vld [vmem:[%s804_s11 + $0xa8] sm:$0xff]  ;;  %v202_v14 = vld [vmem:[%s804_s11 + $0x10] sm:$0xff]  ;;  %v208_v15 = vld [vmem:[%s804_s11 + $0x40] sm:$0xff]  ;;  %p653_p3 = por %p652_p2, %p651_p1 }
  0x1d   : > { %324 = vmatpush.msra.mxu0 %v225_v3  ;;  %566 = vmatpush.msra.mxu1 %v225_v3  ;;  %v215_v16 = vld [vmem:[%s804_s11 + $0x78] sm:$0xff]  ;;  %v222_v17 = vld [vmem:[%s804_s11 + $0xb0] sm:$0xff]  ;;  %v209_v19 = vld [vmem:[%s804_s11 + $0x48] sm:$0xff]  ;;  %p649_p0 = pneg %p648_p13 }
  0x1e   : > { %529 = vmatmul.msk.f32.vlgmr.msra.gmra.mxu0 %vm233_vm0, %v200_v6  ;;  %535 = vmatmul.msk.f32.vlgmr.msra.gmra.mxu1 %vm233_vm0, %v206_v7  ;;  %v203_v18 = vld [vmem:[%s804_s11 + $0x18] sm:$0xff]  ;;  %v216_v20 = vld [vmem:[%s804_s11 + $0x80] sm:$0xff]  ;;  %v210_v23 = vld [vmem:[%s804_s11 + $0x50] sm:$0xff] }
  0x1f   : > { %v223_v21 = vld [vmem:[%s804_s11 + $0xb8] sm:$0xff]  ;;  %v204_v22 = vld [vmem:[%s804_s11 + $0x20] sm:$0xff]  ;;  %v217_v24 = vld [vmem:[%s804_s11 + $0x88] sm:$0xff]  ;;  %p654_p5 = pnand %p653_p3, %p649_p0 }
  0x20   : > { %v224_v25 = vld [vmem:[%s804_s11 + $0xc0] sm:$0xff]  ;;  %v205_v26 = vld [vmem:[%s804_s11 + $0x28] sm:$0xff]  ;;  %v211_v27 = vld [vmem:[%s804_s11 + $0x58] sm:$0xff] }
  0x21   : > { %v218_v28 = vld [vmem:[%s804_s11 + $0x90] sm:$0xff] }
  0x24   : > { %542 = vmatmul.msk.f32.gmra.mxu2 %vm233_vm0, %v213_v8  ;;  %549 = vmatmul.msk.f32.gmra.mxu3 %vm233_vm0, %v220_v9 }
  0x26   : > { %530 = vmatmul.msk.f32.gmra.mxu0 %vm233_vm0, %v201_v10  ;;  %536 = vmatmul.msk.f32.gmra.mxu1 %vm233_vm0, %v207_v11 }
  0x2c   : > { %543 = vmatmul.msk.f32.gmra.mxu2 %vm233_vm0, %v214_v12  ;;  %550 = vmatmul.msk.f32.gmra.mxu3 %vm233_vm0, %v221_v13 }
  0x2e   : > { %531 = vmatmul.msk.f32.gmra.mxu0 %vm233_vm0, %v202_v14  ;;  %537 = vmatmul.msk.f32.gmra.mxu1 %vm233_vm0, %v208_v15 }
  0x34   : > { %544 = vmatmul.msk.f32.gmra.mxu2 %vm233_vm0, %v215_v16  ;;  %551 = vmatmul.msk.f32.gmra.mxu3 %vm233_vm0, %v222_v17 }
  0x36   : > { %532 = vmatmul.msk.f32.gmra.mxu0 %vm233_vm0, %v203_v18  ;;  %538 = vmatmul.msk.f32.gmra.mxu1 %vm233_vm0, %v209_v19 }
  0x3c   : > { %545 = vmatmul.msk.f32.gmra.mxu2 %vm233_vm0, %v216_v20  ;;  %552 = vmatmul.msk.f32.gmra.mxu3 %vm233_vm0, %v223_v21 }
  0x3e   : > { %533 = vmatmul.msk.f32.gmra.mxu0 %vm233_vm0, %v204_v22  ;;  %539 = vmatmul.msk.f32.gmra.mxu1 %vm233_vm0, %v210_v23 }
  0x44   : > { %546 = vmatmul.msk.f32.gmra.mxu2 %vm233_vm0, %v217_v24  ;;  %553 = vmatmul.msk.f32.gmra.mxu3 %vm233_vm0, %v224_v25 }
  0x46   : > { %534 = vmatmul.msk.f32.gmra.mxu0 %vm233_vm0, %v205_v26  ;;  %540 = vmatmul.msk.f32.gmra.mxu1 %vm233_vm0, %v211_v27 }
  0x4c   : > { %547 = vmatmul.msk.f32.gmra.mxu2 %vm233_vm0, %v218_v28 }
  0x9b   : > { %v326_v30 = vpop.f32.mrf.mxu0  ;;  %v344_v31 = vpop.f32.mrf.mxu1 }
  0x9c   : > { %v327_v32 = vadd.f32 %v862_v29, %v326_v30  ;;  %v345_v33 = vadd.f32 %v862_v29, %v344_v31 }
  0x9e   : > { %401 = vst [vmem:[%s866_s26] sm:$0xff] %v327_v32 }
  0x9f   : > { %v362_v34 = vpop.f32.mrf.mxu2  ;;  %407 = vst [vmem:[%s866_s26 + $0x30] sm:$0xff] %v345_v33  ;;  %v383_v35 = vpop.f32.mrf.mxu3 }
  0xa0   : > { %v363_v36 = vadd.f32 %v862_v29, %v362_v34  ;;  %v384_v37 = vadd.f32 %v862_v29, %v383_v35 }
  0xa2   : > { %413 = vst [vmem:[%s866_s26 + $0x60] sm:$0xff] %v363_v36 }
  0xa3   : > { %420 = vst [vmem:[%s866_s26 + $0x98] sm:$0xff] %v384_v37  ;;  %v329_v38 = vpop.f32.mrf.mxu0  ;;  %v347_v39 = vpop.f32.mrf.mxu1 }
  0xa4   : > { %v330_v40 = vadd.f32 %v862_v29, %v329_v38  ;;  %v348_v41 = vadd.f32 %v862_v29, %v347_v39 }
  0xa6   : > { %402 = vst [vmem:[%s866_s26 + $0x8] sm:$0xff] %v330_v40 }
  0xa7   : > { %v365_v42 = vpop.f32.mrf.mxu2  ;;  %408 = vst [vmem:[%s866_s26 + $0x38] sm:$0xff] %v348_v41  ;;  %v386_v43 = vpop.f32.mrf.mxu3 }
  0xa8   : > { %v366_v44 = vadd.f32 %v862_v29, %v365_v42  ;;  %v387_v45 = vadd.f32 %v862_v29, %v386_v43 }
  0xaa   : > { %414 = vst [vmem:[%s866_s26 + $0x68] sm:$0xff] %v366_v44 }
  0xab   : > { %421 = vst [vmem:[%s866_s26 + $0xa0] sm:$0xff] %v387_v45  ;;  %v332_v46 = vpop.f32.mrf.mxu0  ;;  %v350_v47 = vpop.f32.mrf.mxu1 }
  0xac   : > { %v333_v48 = vadd.f32 %v862_v29, %v332_v46  ;;  %v351_v49 = vadd.f32 %v862_v29, %v350_v47 }
  0xae   : > { %403 = vst [vmem:[%s866_s26 + $0x10] sm:$0xff] %v333_v48 }
  0xaf   : > { %v368_v50 = vpop.f32.mrf.mxu2  ;;  %409 = vst [vmem:[%s866_s26 + $0x40] sm:$0xff] %v351_v49  ;;  %v389_v51 = vpop.f32.mrf.mxu3 }
  0xb0   : > { %v369_v52 = vadd.f32 %v862_v29, %v368_v50  ;;  %v390_v53 = vadd.f32 %v862_v29, %v389_v51 }
  0xb2   : > { %415 = vst [vmem:[%s866_s26 + $0x70] sm:$0xff] %v369_v52 }
  0xb3   : > { %422 = vst [vmem:[%s866_s26 + $0xa8] sm:$0xff] %v390_v53  ;;  %v335_v54 = vpop.f32.mrf.mxu0  ;;  %v353_v55 = vpop.f32.mrf.mxu1 }
  0xb4   : > { %v336_v56 = vadd.f32 %v862_v29, %v335_v54  ;;  %v354_v57 = vadd.f32 %v862_v29, %v353_v55 }
  0xb6   : > { %404 = vst [vmem:[%s866_s26 + $0x18] sm:$0xff] %v336_v56 }
  0xb7   : > { %v371_v58 = vpop.f32.mrf.mxu2  ;;  %410 = vst [vmem:[%s866_s26 + $0x48] sm:$0xff] %v354_v57  ;;  %v392_v59 = vpop.f32.mrf.mxu3 }
  0xb8   : > { %v372_v60 = vadd.f32 %v862_v29, %v371_v58  ;;  %v393_v61 = vadd.f32 %v862_v29, %v392_v59 }
  0xba   : > { %416 = vst [vmem:[%s866_s26 + $0x78] sm:$0xff] %v372_v60 }
  0xbb   : > { %423 = vst [vmem:[%s866_s26 + $0xb0] sm:$0xff] %v393_v61  ;;  %v338_v62 = vpop.f32.mrf.mxu0  ;;  %v356_v63 = vpop.f32.mrf.mxu1 }
  0xbc   : > { %v339_v0 = vadd.f32 %v862_v29, %v338_v62  ;;  %v357_v1 = vadd.f32 %v862_v29, %v356_v63 }
  0xbe   : > { %405 = vst [vmem:[%s866_s26 + $0x20] sm:$0xff] %v339_v0 }
  0xbf   : > { %v374_v2 = vpop.f32.mrf.mxu2  ;;  %411 = vst [vmem:[%s866_s26 + $0x50] sm:$0xff] %v357_v1  ;;  %v395_v3 = vpop.f32.mrf.mxu3 }
  0xc0   : > { %v375_v4 = vadd.f32 %v862_v29, %v374_v2  ;;  %v396_v5 = vadd.f32 %v862_v29, %v395_v3 }
  0xc2   : > { %417 = vst [vmem:[%s866_s26 + $0x80] sm:$0xff] %v375_v4 }
  0xc3   : > { %424 = vst [vmem:[%s866_s26 + $0xb8] sm:$0xff] %v396_v5  ;;  %v341_v6 = vpop.f32.mrf.mxu0  ;;  %v359_v7 = vpop.f32.mrf.mxu1 }
  0xc4   : > { %v342_v8 = vadd.f32 %v862_v29, %v341_v6  ;;  %v360_v9 = vadd.f32 %v862_v29, %v359_v7 }
  0xc6   : > { %406 = vst [vmem:[%s866_s26 + $0x28] sm:$0xff] %v342_v8 }
  0xc7   : > { %v377_v10 = vpop.f32.mrf.mxu2  ;;  %412 = vst [vmem:[%s866_s26 + $0x58] sm:$0xff] %v360_v9  ;;  %v398_v11 = vpop.f32.mrf.mxu3 }
  0xc8   : > { %v378_v12 = vadd.f32 %v862_v29, %v377_v10  ;;  %v399_v13 = vadd.f32 %v862_v29, %v398_v11 }
  0xca   : > { %418 = vst [vmem:[%s866_s26 + $0x88] sm:$0xff] %v378_v12 }
  0xcb   : > { %425 = vst [vmem:[%s866_s26 + $0xc0] sm:$0xff] %v399_v13 }
  0xcf   : > { %v380_v14 = vpop.f32.mrf.mxu2 }
  0xd0   : > { %v381_v15 = vadd.f32 %v862_v29, %v380_v14 }
  0xd2   : > { %419 = vst [vmem:[%s866_s26 + $0x90] sm:$0xff] %v381_v15 }
  0xd3   : > { %657 = shalt.err (!%p654_p5)
}
  0xd4   : > { %s710_s18 = smov 128   ;;  %s711_s21 = smov 8  }
  0xd5   : > { %572 = dma.vmem_to_hbm [thread:$0]  (%p772_p4), %s442_s4, 3200, %s444_s5, %s427_s15, %s710_s18, %s710_s18, %s711_s21  }
  0xd6 PF: > { %p578_p6 = scmp.ge.s32.totalorder %s708_s17, 2  ;;  %s458_s23 = sand.u32 1, %s688_s12  }
  0xd7   : > { %s459_s26 = scalar_lea.sflag [#allocation3], %s458_s23 }
  0xd8   : > { %p575_p7 = pnand %p578_p6, %p779_p8 }
  0xda   : > { %p576_p9 = pneg %p575_p7 }
  0xdc   : > { %683 = dma.done.wait (%p576_p9), %s459_s26, 3200  }
  0xdd   : > { %685 = vsyncadd (%p576_p9), %s459_s26, 4294964096  ;;  %s16_s17 = sadd.s32 1, %s708_s17   ;;  %s961_s12 = smov %s692_s13 }
  0xde   : > { %p13_p10 = scmp.ge.s32.totalorder %s16_s17, 4   ;;  %s962_s13 = smov %s696_s14 }
  0xdf   : > { %s963_s14 = smov %s785_s25  ;;  %s964_s15 = smov %s704_s16 }
  0xe0   : > { %s965_s16 = smov %s967_s20  ;;  %15 = sbr.rel (!%p13_p10) target bundleno = 4 (0x4), region = 67 }
  0xe5   :  { %465 = vsyncpa [#allocation3], 1 }
  0xe6   :  { %467 = vsyncpa [#allocation3 + $0x1], 1 }

</bundles_post_ra>
